<compile_context>
chip_gen: v7x
topology: tpu7x:2x2x1
jax: 0.10.0
libtpu: 0.0.40
codegen_flags: <defaults>
</compile_context>

<pallas_src>
import jax
import jax.numpy as jnp
from jax.experimental import pallas as pl
from jax.experimental.pallas import tpu as pltpu


# --------------------------- tuning constants ----------------------------- #
_MIN_PALLAS_ELEMS = 4096              # below this, XLA gather beats the launch
_MAX_ONEHOT_TABLE_ROWS = 1024         # bound the (TB, P*E) one-hot / matmul K
_MAX_RESIDENT_TABLE_BYTES = 8 * 1024 * 1024   # packed table; x2 double-buffered


def _round_up(x: int, m: int) -> int:
    return ((x + m - 1) // m) * m


def _pack_factor(dim: int) -> int:
    """How many embedding rows fit side by side in a 128-lane output row."""
    return max(1, 128 // dim)


def make_packed_table(table: jax.Array) -> jax.Array:
    """Block-diagonal replica of the table: (P*E, P*D). Built once."""
    p = _pack_factor(table.shape[1])
    return jnp.kron(jnp.eye(p, dtype=table.dtype), table)


# ----------------------------- Pallas kernel ------------------------------ #
def _embed_onehot_kernel(ids_ref, table_ref, out_ref):
    """Lane-dense one-hot MXU gather of a tile of row-groups.

    ids_ref:   (TBG, P)    int32   VMEM -- indices already offset into the
                                           block-diagonal table (p*E + idx).
    table_ref: (P*E, P*D)  float32 VMEM -- block-diagonal replicated table
                                           (constant block, DMA'd once).
    out_ref:   (TBG, P*D)  float32 VMEM -- P packed embeddings per output row
                                           (dense 128-lane stores).
    """
    tbg, pack = ids_ref.shape
    pe = table_ref.shape[0]

    # One-hot built in f32 from int compares (VPU-friendly on v5e too).
    cols = jax.lax.broadcasted_iota(jnp.int32, (tbg, pe), 1)      # (TBG, P*E)
    hit = cols == ids_ref[:, 0:1]
    for p in range(1, pack):                                      # static P
        hit = jnp.logical_or(hit, cols == ids_ref[:, p:p + 1])
    onehot = hit.astype(table_ref.dtype)

    # HIGHEST precision: 3-way bf16 decomposition reconstructs the f32 table
    # rows exactly (the one-hot operand is exactly 0/1) -> bit-exact gather.
    out_ref[...] = jnp.dot(
        onehot,
        table_ref[...],
        preferred_element_type=jnp.float32,
        precision=jax.lax.Precision.HIGHEST,
    ).astype(out_ref.dtype)


# ------------------------------ host wrapper ------------------------------ #
def embedding_lookup(indices: jax.Array, table: jax.Array, *,
                     packed_table: jax.Array | None = None,
                     row_tile_groups: int = 128,
                     force_pallas: bool = False) -> jax.Array:
    """Gather rows of `table` at `indices`.

    indices: int32 [N]
    table:   float32 [num_embeddings, embedding_dim]
    returns: float32 [N, embedding_dim]
    """
    n = int(indices.shape[0])
    num_emb, dim = table.shape

    # Clamp so an out-of-range index can never drive an OOB access.
    idx = jnp.clip(indices.astype(jnp.int32), 0, num_emb - 1)

    pack = _pack_factor(dim)
    packed_bytes = pack * pack * num_emb * dim * table.dtype.itemsize

    use_pallas = force_pallas or (
        n * dim >= _MIN_PALLAS_ELEMS
        and num_emb <= _MAX_ONEHOT_TABLE_ROWS
        and packed_bytes <= _MAX_RESIDENT_TABLE_BYTES
    )
    if not use_pallas:
        # Tiny batches (launch/padding/table-DMA dominate) or tables too big
        # for the VMEM-resident one-hot path: plain XLA gather.
        # TODO(synk): scalar-prefetch pl.Element row-gather path for big tables.
        return jnp.take(table, idx, axis=0)

    if packed_table is None:
        packed_table = make_packed_table(table)
    pe, pd = packed_table.shape               # (P*E, P*D); P*D is lane-dense

    # --- row-group tiling ---------------------------------------------------
    groups = -(-n // pack)
    if groups <= 8:
        tbg = 8
    else:
        # >= 2 grid steps when there is enough work, so the "parallel" axis
        # actually shards across both v7x TensorCores; capped by the tile cap.
        tbg = min(row_tile_groups, _round_up(-(-groups // 2), 8))
    groups_pad = _round_up(groups, tbg)
    n_pad = groups_pad * pack

    # Padded rows gather table row 0 and are sliced off below; never reduce
    # over the padded output.
    idx_pad = jnp.pad(idx, (0, n_pad - n))
    offsets = (jnp.arange(pack, dtype=jnp.int32) * num_emb)[None, :]
    packed_ids = idx_pad.reshape(groups_pad, pack) + offsets      # (G, P)

    grid = (groups_pad // tbg,)

    out_packed = pl.pallas_call(
        _embed_onehot_kernel,
        out_shape=jax.ShapeDtypeStruct((groups_pad, pd), table.dtype),
        grid_spec=pl.GridSpec(
            grid=grid,
            in_specs=[
                # Per-tile packed indices (last dim == full array dim).
                pl.BlockSpec((tbg, pack), lambda i: (i, 0)),
                # Whole packed table; constant block index -> fetched once and
                # kept VMEM-resident across the grid (<= 8 MiB, so even the
                # default double-buffering fits v7x's scoped VMEM easily).
                pl.BlockSpec((pe, pd), lambda i: (0, 0)),
            ],
            out_specs=pl.BlockSpec((tbg, pd), lambda i: (i, 0)),
        ),
        compiler_params=pltpu.CompilerParams(
            dimension_semantics=("parallel",),
        ),
    )(packed_ids, packed_table)

    # Un-pack: group g, lane block p  ->  original row g*P + p.
    return out_packed.reshape(n_pad, dim)[:n]


# ------------------------- UserModel (JAX wrapper) ------------------------ #
class UserModelPallas:
    """JAX/Pallas equivalent of the PyTorch UserModel."""

    def __init__(self, embedding_dim: int, user_ids):
        ids = jnp.asarray(user_ids, dtype=jnp.int32)
        # LabelEncoder.fit: classes_ = sorted unique labels.
        self.classes_ = jnp.sort(jnp.unique(ids))
        # Spec: num_embeddings = len(transform(user_ids)) == len(user_ids).
        num_embeddings = int(ids.shape[0])
        # Deterministic init mimicking nn.Embedding default N(0, 1).
        key = jax.random.PRNGKey(0)
        self.embedding = jax.random.normal(
            key, (num_embeddings, embedding_dim), dtype=jnp.float32
        )
        # Lane-dense block-diagonal replica, built once (perf review item 1).
        self._packed_table = make_packed_table(self.embedding)

    def label_transform(self, x):
        x = jnp.asarray(x, dtype=jnp.int32)
        idx = jnp.searchsorted(self.classes_, x).astype(jnp.int32)
        # sklearn's LabelEncoder raises on unseen labels; here an unseen id
        # clamps to its insertion point (valid-but-arbitrary row).
        # TODO(synk): explicit membership check / dedicated OOV row if unseen
        # ids can occur in production.
        return jnp.clip(idx, 0, self.embedding.shape[0] - 1)

    def __call__(self, x, *, force_pallas: bool = False):
        idx = self.label_transform(x)
        return embedding_lookup(
            idx, self.embedding,
            packed_table=self._packed_table,
            force_pallas=force_pallas,
        )


# --------------------------------- main ----------------------------------- #
if __name__ == "__main__":
    EMBEDDING_DIM = 32
    # Synthetic raw user ids (non-contiguous to exercise label encoding).
    user_ids = [1001, 1003, 1007, 1010, 1015, 1021, 1022, 1030,
                1031, 1040, 1041, 1042, 1050, 1051, 1060, 1061]

    model = UserModelPallas(EMBEDDING_DIM, user_ids)
    uid_arr = jnp.asarray(user_ids, dtype=jnp.int32)

    # Batch large enough to take the Pallas lane-dense path and give the
    # "parallel" grid axis 2 steps (one per v7x TensorCore).
    key = jax.random.PRNGKey(0)
    pick_big = jax.random.randint(key, (512,), 0, len(user_ids))
    x_big = uid_arr[pick_big]
    out_big = jax.block_until_ready(model(x_big))

    ref_big = model.embedding[model.label_transform(x_big)]
    assert out_big.shape == (512, EMBEDDING_DIM)
    assert jnp.allclose(out_big, ref_big, rtol=0.0, atol=1e-6), \
        "Pallas lane-dense gather mismatch vs reference"

    # Tiny batch (the module's natural shape): takes the XLA-gather fast path.
    pick_small = jax.random.randint(jax.random.PRNGKey(1), (8,), 0, len(user_ids))
    x_small = uid_arr[pick_small]
    out_small = jax.block_until_ready(model(x_small))
    ref_small = model.embedding[model.label_transform(x_small)]
    assert out_small.shape == (8, EMBEDDING_DIM)
    assert jnp.allclose(out_small, ref_small, rtol=0.0, atol=1e-6), \
        "fast-path gather mismatch vs reference"

    print("KERNEL_OK")
</pallas_src>

<mosaic_0001>
module attributes {stable_mosaic.version = 11 : i64} {
  func.func @_embed_onehot_kernel(%arg0: i32, %arg1: memref<64x4xi32, #tpu.memory_space<vmem>>, %arg2: memref<64x128xf32, #tpu.memory_space<vmem>>, %arg3: memref<64x128xf32, #tpu.memory_space<vmem>>) attributes {dimension_semantics = [#tpu.dimension_semantics<parallel>], iteration_bounds = array<i64: 2>, scalar_prefetch = 0 : i64, scratch_operands = 0 : i64, tpu.core_type = #tpu.core_type<tc>, window_params = [{transform_indices = @transform_0, window_bounds = array<i64: 64, 4>}, {pipeline_mode = #tpu.pipeline_mode<synchronous>, transform_indices = @transform_1, window_bounds = array<i64: 64, 128>}, {transform_indices = @transform_2, window_bounds = array<i64: 64, 128>}]} {
    %0 = tpu.iota {dimensions = array<i32: 1>} : vector<64x64xi32>
    %c0 = arith.constant 0 : index
    %c0_0 = arith.constant 0 : index
    %1 = vector.load %arg1[%c0, %c0_0] : memref<64x4xi32, #tpu.memory_space<vmem>>, vector<64x1xi32>
    %2 = vector.broadcast %1 : vector<64x1xi32> to vector<64x64xi32>
    %3 = arith.cmpi eq, %0, %2 : vector<64x64xi32>
    %c0_1 = arith.constant 0 : index
    %c1 = arith.constant 1 : index
    %4 = vector.load %arg1[%c0_1, %c1] : memref<64x4xi32, #tpu.memory_space<vmem>>, vector<64x1xi32>
    %5 = vector.broadcast %4 : vector<64x1xi32> to vector<64x64xi32>
    %6 = arith.cmpi eq, %0, %5 : vector<64x64xi32>
    %7 = arith.ori %3, %6 : vector<64x64xi1>
    %c0_2 = arith.constant 0 : index
    %c2 = arith.constant 2 : index
    %8 = vector.load %arg1[%c0_2, %c2] : memref<64x4xi32, #tpu.memory_space<vmem>>, vector<64x1xi32>
    %9 = vector.broadcast %8 : vector<64x1xi32> to vector<64x64xi32>
    %10 = arith.cmpi eq, %0, %9 : vector<64x64xi32>
    %11 = arith.ori %7, %10 : vector<64x64xi1>
    %c0_3 = arith.constant 0 : index
    %c3 = arith.constant 3 : index
    %12 = vector.load %arg1[%c0_3, %c3] : memref<64x4xi32, #tpu.memory_space<vmem>>, vector<64x1xi32>
    %13 = vector.broadcast %12 : vector<64x1xi32> to vector<64x64xi32>
    %14 = arith.cmpi eq, %0, %13 : vector<64x64xi32>
    %15 = arith.ori %11, %14 : vector<64x64xi1>
    %16 = arith.extui %15 : vector<64x64xi1> to vector<64x64xi32>
    %17 = arith.sitofp %16 : vector<64x64xi32> to vector<64x64xf32>
    %c0_4 = arith.constant 0 : index
    %c0_5 = arith.constant 0 : index
    %18 = vector.load %arg2[%c0_4, %c0_5] : memref<64x128xf32, #tpu.memory_space<vmem>>, vector<64x128xf32>
    %cst = arith.constant dense<0.000000e+00> : vector<64x128xf32>
    %19 = tpu.matmul %17, %18, %cst {dimension_numbers = #tpu.dot_dimension_numbers<[1], [0], [0], [1], [0, 0, 1, 1], [], []>, precision = #tpu.contract_precision<fp32>} : vector<64x64xf32>, vector<64x128xf32>, vector<64x128xf32> -> vector<64x128xf32>
    %c0_6 = arith.constant 0 : index
    %c0_7 = arith.constant 0 : index
    %20 = vector.load %arg3[%c0_6, %c0_7] : memref<64x128xf32, #tpu.memory_space<vmem>>, vector<64x128xf32>
    tpu.vector_store %arg3[%c0_6, %c0_7], %19 {strides = array<i32>} : memref<64x128xf32, #tpu.memory_space<vmem>>, vector<64x128xf32>,
    return
  }
  func.func @transform_0(%arg0: i32) -> (i32, i32) {
    %c0_i32 = arith.constant 0 : i32
    %c0_i32_0 = arith.constant 0 : i32
    return %arg0, %c0_i32 : i32, i32
  }
  func.func @transform_1(%arg0: i32) -> (i32, i32) {
    %c0_i32 = arith.constant 0 : i32
    %c0_i32_0 = arith.constant 0 : i32
    %c0_i32_1 = arith.constant 0 : i32
    return %c0_i32, %c0_i32_0 : i32, i32
  }
  func.func @transform_2(%arg0: i32) -> (i32, i32) {
    %c0_i32 = arith.constant 0 : i32
    %c0_i32_0 = arith.constant 0 : i32
    return %arg0, %c0_i32 : i32, i32
  }
}

</mosaic_0001>

<bundles_post_ra>
// kernel: tpu_custom_call.1
= control target key start
LH: loop header
LB: loop body
LE: loop exit
PB: predicated region body
PF: predicated region fallthrough
CT: control target
= control target key end

     0   :  { %7 = vsyncpa [#allocation3], 0  ;;  %s2345_s0 = inlined_call_operand.vmem [shape: s32[128,4], index: 0, kind: input, shape index: {}]   ;;  %s2346_s1 = inlined_call_operand.vmem [shape: f32[64,128], index: 1, kind: input, shape index: {}]   ;;  %s2347_s2 = inlined_call_operand.hbm [shape: f32[128,128], index: 2, kind: output, shape index: {}]  }
   0x1   :  { %9 = vsyncpa [#allocation3 + $0x1], 0  ;;  %s1878_s9 = smov 0   ;;  %s1880_s10 = smov 0  }
   0x2   :  { %s1882_s11 = smov 0   ;;  %s1884_s12 = smov 0  }
   0x3 LB: > { %s1899_s13 = sadd.s32 4294967295, %s1853_s12   ;;  %s1278_s14 = sadd.s32 4294967294, %s1853_s12   ;;  %s1853_s12 = sphi %s1884_s12, %s2353_s12   ;;  %s1849_s11 = sphi %s1882_s11, %s2352_s11   ;;  %s1845_s10 = sphi %s1880_s10, %s2351_s10   ;;  %s1841_s9 = sphi %s1878_s9, %s2350_s9  }
   0x4   : > { %s1903_s15 = sadd.s32 1, %s1853_s12   ;;  %s69_s16 = sadd.s32 1, %s1849_s11 }
   0x5   : > { %s66_s17 = ssub.s32 %s1853_s12, %s1903_s15  ;;  %p79_p0 = scmp.ne.s32.totalorder %s1849_s11, %s1845_s10 }
   0x6   : > { %p67_p1 = scmp.eq.s32.totalorder %s66_s17, 0  ;;  %p80_p2 = scmp.eq.s32.totalorder %s1899_s13, 1 }
   0x7   : > { %p85_p3 = scmp.ne.s32.totalorder %s1845_s10, %s1841_s9  ;;  %p86_p4 = scmp.eq.s32.totalorder %s1278_s14, 1 }
   0x8   : > { %s1914_s18 = scalar_select %p67_p1, %s1849_s11, %s69_s16  }
   0x9   : > { %p1916_p5 = por %p80_p2, %p79_p0  ;;  %p1920_p6 = por %p86_p4, %p85_p3 }
   0xa   : > { %p1281_p7 = scmp.ge.s32.totalorder %s1853_s12, 1  ;;  %p116_p8 = scmp.lt.s32.totalorder %s1853_s12, 3 }
   0xc   : > { %p117_p9 = pnand %p1281_p7, %p116_p8 }
   0xd   : > { %s1283_s21 = sshll.u32 (!%p117_p9), %s1899_s13, 3  ;;  %v1855_v0 = vmov (!%p117_p9), 1   ;;  %v1856_v1 = vmov (!%p117_p9), 0   ;;  %v1857_v6 = vmov (!%p117_p9), 2   ;;  %v1858_v7 = vmov (!%p117_p9), 3   ;;  %v1954_v9 = vld [vmem:[%s2346_s1] sm:$0xff] (!%p117_p9) }
   0xe   : > { %120 = sbr.rel (%p117_p9) target bundleno = 522 (0x20a), region = 28  ;;  %1769 = vset.pattern.permute.xlu0 (!%p117_p9), %v1855_v0  ;;  %1770 = vset.pattern.permute.xlu1 (!%p117_p9), %v1856_v1  ;;  %p139_p10 = scmp.lt.s32.totalorder (!%p117_p9), %s1283_s21, 15  ;;  %v1959_v10 = vld [vmem:[%s2346_s1 + $0x8] sm:$0xff] (!%p117_p9)  ;;  %v357_v11 = vand.u32 (!%p117_p9), 4294901760, %v1954_v9  ;;  %v1974_v15 = vld [vmem:[%s2346_s1 + $0x10] sm:$0xff] (!%p117_p9)  ;;  %v1979_v16 = vld [vmem:[%s2346_s1 + $0x18] sm:$0xff] (!%p117_p9) }
   0xf   : > { %v360_v12 = vand.u32 (!%p117_p9), 4294901760, %v1959_v10  ;;  %v363_v17 = vand.u32 (!%p117_p9), 4294901760, %v1974_v15  ;;  %v366_v18 = vand.u32 (!%p117_p9), 4294901760, %v1979_v16  ;;  %v1998_v20 = vld [vmem:[%s2346_s1 + $0x20] sm:$0xff] (!%p117_p9)  ;;  %v2003_v21 = vld [vmem:[%s2346_s1 + $0x28] sm:$0xff] (!%p117_p9)  ;;  %v2022_v25 = vld [vmem:[%s2346_s1 + $0x30] sm:$0xff] (!%p117_p9) }
  0x10   : > { %v369_v22 = vand.u32 (!%p117_p9), 4294901760, %v1998_v20  ;;  %v372_v23 = vand.u32 (!%p117_p9), 4294901760, %v2003_v21  ;;  %v2027_v26 = vld [vmem:[%s2346_s1 + $0x38] sm:$0xff] (!%p117_p9)  ;;  %v375_v27 = vand.u32 (!%p117_p9), 4294901760, %v2022_v25  ;;  %v511_v32 = vsub.f32 (!%p117_p9), %v1954_v9, %v357_v11  ;;  %s135_s23 = sand.u32 (!%p117_p9), 1, %s1845_s10   ;;  %s1322_s26 = sshll.u32 (!%p117_p9), %s1899_s13, 10 }
  0x11   : > { %v1969_v14 = vpack.c.bf16 (!%p117_p9), %v360_v12, %v357_v11  ;;  %v1991_v19 = vpack.c.bf16 (!%p117_p9), %v366_v18, %v363_v17  ;;  %v378_v28 = vand.u32 (!%p117_p9), 4294901760, %v2027_v26  ;;  %v518_v33 = vsub.f32 (!%p117_p9), %v1959_v10, %v360_v12  ;;  %s1282_s24 = sshll.u32 (!%p117_p9), %s135_s23, 6  ;;  %s2298_s30 = scalar_lea.hbm (!%p117_p9), %s2347_s2, %s1322_s26 }
  0x12   : > { %v2015_v24 = vpack.c.bf16 (!%p117_p9), %v372_v23, %v369_v22  ;;  %v512_v34 = vand.u32 (!%p117_p9), 4294901760, %v511_v32  ;;  %v525_v39 = vsub.f32 (!%p117_p9), %v1974_v15, %v363_v17  ;;  %v532_v40 = vsub.f32 (!%p117_p9), %v1979_v16, %v366_v18  ;;  %s2304_s13 = scalar_lea.sflag (!%p117_p9), [#allocation3], %s135_s23  ;;  %s1860_s4 = smov (!%p117_p9), [#allocation2]  }
  0x13   : > { %1636 = vmatprep.subr.bf16.mxu0 (!%p117_p9), %v1969_v14  ;;  %1588 = vmatprep.subr.bf16.mxu1 (!%p117_p9), %v1969_v14  ;;  %v2039_v30 = vpack.c.bf16 (!%p117_p9), %v378_v28, %v375_v27  ;;  %v519_v35 = vand.u32 (!%p117_p9), 4294901760, %v518_v33  ;;  %v539_v47 = vsub.f32 (!%p117_p9), %v1998_v20, %v369_v22  ;;  %v546_v48 = vsub.f32 (!%p117_p9), %v2003_v21, %v372_v23  ;;  %s1795_s5 = sshll.u32 (!%p117_p9), %s1860_s4, 4  ;;  %s1796_s5 = int_to_ptr.vmem [resolvable:$false] %s1795_s5 }
  0x14   : > { %1638 = vmatpush3.bf16.msra.mxu0 (!%p117_p9), %v1969_v14  ;;  %1590 = vmatpush3.bf16.msra.mxu1 (!%p117_p9), %v1969_v14  ;;  %v513_v37 = vsub.f32 (!%p117_p9), %v511_v32, %v512_v34  ;;  %v526_v43 = vand.u32 (!%p117_p9), 4294901760, %v525_v39  ;;  %v533_v44 = vand.u32 (!%p117_p9), 4294901760, %v532_v40  ;;  %v553_v58 = vsub.f32 (!%p117_p9), %v2022_v25, %v375_v27  ;;  %s1797_s6 = scalar_lea.vmem (!%p117_p9), %s1796_s5, 2048 }
  0x15   : > { %s2355_s21 = smov (!%p139_p10, %s1283_s21), 15  ;;  %1640 = vmatprep.subr.bf16.mxu0 %v1991_v19  ;;  %1592 = vmatprep.subr.bf16.mxu1 %v1991_v19  ;;  %v2067_v36 = vpack.c.bf16 %v519_v35, %v512_v34  ;;  %v520_v38 = vsub.f32 %v518_v33, %v519_v35  ;;  %v540_v52 = vand.u32 4294901760, %v539_v47  ;;  %v547_v53 = vand.u32 4294901760, %v546_v48 }
  0x16   : > { %s1284_s22 = sshll.u32 %s2355_s21, 3  ;;  %v514_v41 = vand.u32 4294901760, %v513_v37  ;;  %v527_v46 = vsub.f32 %v525_v39, %v526_v43  ;;  %v2085_v49 = vpack.c.bf16 %v533_v44, %v526_v43  ;;  %v534_v50 = vsub.f32 %v532_v40, %v533_v44 }
  0x17   : > { %s1932_s25 = scalar_lea.vmem %s2345_s0, %s1284_s22  ;;  %v521_v42 = vand.u32 4294901760, %v520_v38  ;;  %v2088_v55 = vpack.c.bf16 %v547_v53, %v540_v52  ;;  %v541_v56 = vsub.f32 %v539_v47, %v540_v52  ;;  %v548_v57 = vsub.f32 %v546_v48, %v547_v53 }
  0x18   : > { %v148_v2 = vld [vmem:[%s1932_s25 + $0x8] sm:$0xff]  ;;  %v147_v3 = vld [vmem:[%s1932_s25] sm:$0xff]  ;;  %v1937_v4 = vld [vmem:[%s1932_s25 + $0x18] sm:$0xff]  ;;  %1642 = vmatpush3.bf16.msra.mxu0 %v1991_v19  ;;  %1594 = vmatpush3.bf16.msra.mxu1 %v1991_v19  ;;  %v528_v51 = vand.u32 4294901760, %v527_v46  ;;  %v535_v54 = vand.u32 4294901760, %v534_v50  ;;  %v560_v60 = vsub.f32 %v2027_v26, %v378_v28  ;;  %v554_v63 = vand.u32 4294901760, %v553_v58 }
  0x19   : > { %159 = vperm.xlu1 %1770, %v148_v2   ;;  %188 = vperm.xlu0 %1769, %v147_v3   ;;  %v1942_v5 = vld [vmem:[%s1932_s25 + $0x20] sm:$0xff]  ;;  %v149_v8 = vld [vmem:[%s1932_s25 + $0x10] sm:$0xff]  ;;  %v152_v13 = vld [vmem:[%s1932_s25 + $0x28] sm:$0xff]  ;;  %v2077_v45 = vpack.c.bf16 %v521_v42, %v514_v41  ;;  %v542_v61 = vand.u32 4294901760, %v541_v56  ;;  %v549_v62 = vand.u32 4294901760, %v548_v57  ;;  %v2106_v9 = vpack.c.bf16 %v532_v40, %v525_v39 }
  0x1a   : > { %1644 = vmatprep.subr.bf16.mxu0 %v2015_v24  ;;  %v154_v29 = vld [vmem:[%s1932_s25 + $0x38] sm:$0xff]  ;;  %1596 = vmatprep.subr.bf16.mxu1 %v2015_v24  ;;  %v153_v31 = vld [vmem:[%s1932_s25 + $0x30] sm:$0xff]  ;;  %v2093_v59 = vpack.c.bf16 %v535_v54, %v528_v51  ;;  %v2108_v10 = vpack.c.bf16 %v546_v48, %v539_v47  ;;  %v2110_v11 = vpack.c.bf16 %v560_v60, %v553_v58  ;;  %v145_v20 = vlaneseq  ;;  %s137_s25 = scalar_lea.vmem [#allocation2], %s1282_s24 }
  0x1b   : > { %vm331_vm7 = vcmask 523264   ;;  %s1216_s27 = sshll.u32 %s137_s25, 4  ;;  %s2300_s27 = int_to_ptr.vmem [resolvable:$true] %s1216_s27 }
  0x1c   : > { %1646 = vmatpush3.bf16.msra.mxu0 %v2015_v24  ;;  %1598 = vmatpush3.bf16.msra.mxu1 %v2015_v24  ;;  %v2114_v23 = vand.u32 127, %v145_v20  ;;  %s1791_s3 = scalar_lea.vmem %s2300_s27, 1024  ;;  %p1798_p0 = scmp.lt.s32.totalorder %s2300_s27, %s1796_s5 }
  0x1d   : > { %1771 = vset.pattern.permute.xlu1 %v1855_v0  ;;  %197 = vperm.xlu0 %1769, %v1937_v4   ;;  %p1792_p11 = scmp.ne.s32.totalorder %s2300_s27, %s1791_s3  ;;  %p1799_p1 = scmp.lt.s32.totalorder %s1797_s6, %s1791_s3 }
  0x1e   : > { %191 = vperm.xlu1 %1771, %v148_v2   ;;  %1648 = vmatprep.subr.bf16.mxu0 %v2039_v30 }
  0x1f   : > { %1600 = vmatprep.subr.bf16.mxu1 %v2039_v30  ;;  %p1793_p12 = pnand %p1792_p11, %p1916_p5  ;;  %p1800_p2 = por %p1799_p1, %p1798_p0 }
  0x20   : > { %1650 = vmatpush3.bf16.msra.mxu0 %v2039_v30  ;;  %1602 = vmatpush3.bf16.msra.mxu1 %v2039_v30 }
  0x21   : > { %200 = vperm.xlu0 %1769, %v1942_v5   ;;  %1652 = vmatprep.subr.bf16.mxu0 %v2067_v36  ;;  %p1794_p13 = pneg %p1793_p12 }
  0x22   : > { %1772 = vset.pattern.permute.xlu1 %v1857_v6  ;;  %1604 = vmatprep.subr.bf16.mxu1 %v2077_v45 }
  0x23   : > { %228 = vperm.xlu1 %1772, %v147_v3   ;;  %p1801_p3 = pnand %p1800_p2, %p1794_p13 }
  0x25   : > { %1779 = vset.pattern.permute.xlu0 %v1857_v6 }
  0x26   : > { %231 = vperm.xlu0 %1779, %v148_v2  }
  0x27   : > { %1773 = vset.pattern.permute.xlu1 %v1858_v7 }
  0x28   : > { %268 = vperm.xlu1 %1773, %v147_v3  }
  0x2a   : > { %240 = vperm.xlu0 %1779, %v1942_v5  }
  0x2c   : > { %271 = vperm.xlu1 %1773, %v148_v2   ;;  %v555_v2 = vsub.f32 %v553_v58, %v554_v63 }
  0x2e   : > { %1781 = vset.pattern.permute.xlu0 %v1858_v7 }
  0x2f   : > { %274 = vperm.xlu0 %1781, %v149_v8  }
  0x30   : > { %1774 = vset.pattern.permute.xlu1 %v1855_v0 }
  0x31   : > { %194 = vperm.xlu1 %1774, %v149_v8  }
  0x33   : > { %283 = vperm.xlu0 %1781, %v152_v13  }
  0x35   : > { %1775 = vset.pattern.permute.xlu1 %v1856_v1 }
  0x36   : > { %165 = vperm.xlu1 %1775, %v1937_v4  }
  0x37   : > { %1784 = vset.pattern.permute.xlu0 %v1856_v1 }
  0x38   : > { %156 = vperm.xlu0 %1784, %v147_v3  }
  0x3a   : > { %1776 = vset.pattern.permute.xlu1 %v1857_v6 }
  0x3b   : > { %234 = vperm.xlu1 %1776, %v149_v8  }
  0x3c   : > { %162 = vperm.xlu0 %1784, %v149_v8   ;;  %v2104_v8 = vpack.c.bf16 %v518_v33, %v511_v32 }
  0x3f   : > { %237 = vperm.xlu1 %1776, %v1937_v4  }
  0x40   : > { %177 = vperm.xlu0 %1784, %v154_v29  }
  0x43   : > { %1777 = vset.pattern.permute.xlu1 %v1858_v7 }
  0x44   : > { %277 = vperm.xlu1 %1777, %v1937_v4   ;;  %1788 = vset.pattern.permute.xlu0 %v1857_v6 }
  0x45   : > { %249 = vperm.xlu0 %1788, %v154_v29  }
  0x48   : > { %1778 = vset.pattern.permute.xlu1 %v1856_v1 }
  0x49   : > { %168 = vperm.xlu1 %1778, %v1942_v5   ;;  %1790 = vset.pattern.permute.xlu0 %v1858_v7 }
  0x4d   : > { %171 = vperm.xlu1 %1778, %v152_v13  }
  0x51   : > { %1780 = vset.pattern.permute.xlu1 %v1855_v0 }
  0x52   : > { %203 = vperm.xlu1 %1780, %v152_v13  }
  0x56   : > { %1782 = vset.pattern.permute.xlu1 %v1857_v6 }
  0x57   : > { %243 = vperm.xlu1 %1782, %v152_v13  }
  0x5b   : > { %1783 = vset.pattern.permute.xlu1 %v1858_v7 }
  0x5c   : > { %280 = vperm.xlu1 %1783, %v1942_v5   ;;  %v556_v5 = vand.u32 4294901760, %v555_v2 }
  0x60   : > { %1785 = vset.pattern.permute.xlu1 %v1856_v1  ;;  %v2098_v1 = vpack.c.bf16 %v549_v62, %v542_v61 }
  0x61   : > { %174 = vperm.xlu1 %1785, %v153_v31  }
  0x65   : > { %1786 = vset.pattern.permute.xlu1 %v1855_v0  ;;  %v561_v0 = vand.u32 4294901760, %v560_v60 }
  0x66   : > { %206 = vperm.xlu1 %1786, %v153_v31  }
  0x67   : > { %v2100_v3 = vpack.c.bf16 %v561_v0, %v554_v63  ;;  %v562_v4 = vsub.f32 %v560_v60, %v561_v0 }
  0x6a   : > { %209 = vperm.xlu1 %1786, %v154_v29  }
  0x6e   : > { %1787 = vset.pattern.permute.xlu1 %v1857_v6  ;;  %v563_v6 = vand.u32 4294901760, %v562_v4 }
  0x6f   : > { %246 = vperm.xlu1 %1787, %v153_v31  }
  0x73   : > { %1789 = vset.pattern.permute.xlu1 %v1858_v7  ;;  %v2102_v7 = vpack.c.bf16 %v563_v6, %v556_v5 }
  0x74   : > { %286 = vperm.xlu1 %1789, %v153_v31   ;;  %v1859_v31 = vmov 0.0  }
  0x78   : > { %289 = vperm.xlu1 %1789, %v154_v29  }
  0x98   : > { %v160_v12 = vpop.permute.xlu1 %159  ;;  %v189_v13 = vpop.permute.xlu0 %188 }
  0x99   : > { %vm180_vm2 = vcmp.eq.s32.totalorder %v2114_v23, %v160_v12  ;;  %vm211_vm8 = vcmp.eq.s32.totalorder %v2114_v23, %v189_v13 }
  0x9c   : > { %v198_v15 = vpop.permute.xlu0 %197 }
  0x9d   : > { %v192_v16 = vpop.permute.xlu1 %191 }
  0x9e   : > { %vm212_vm0 = vcmp.eq.s32.totalorder %v2114_v23, %v192_v16 }
  0x9f   : > { %vm220_vm4 = vmor %vm180_vm2, %vm212_vm0 }
  0xa0   : > { %v2112_v17 = vpop.permute.xlu0 %200 }
  0xa2   : > { %v229_v18 = vpop.permute.xlu1 %228 }
  0xa3   : > { %vm251_vm10 = vcmp.eq.s32.totalorder %v2114_v23, %v229_v18 }
  0xa5   : > { %v232_v21 = vpop.permute.xlu0 %231 }
  0xa6   : > { %vm252_vm1 = vcmp.eq.s32.totalorder %v2114_v23, %v232_v21 }
  0xa7   : > { %v269_v22 = vpop.permute.xlu1 %268  ;;  %vm260_vm5 = vmor %vm220_vm4, %vm252_vm1 }
  0xa8   : > { %vm291_vm12 = vcmp.eq.s32.totalorder %v2114_v23, %v269_v22 }
  0xa9   : > { %v2116_v25 = vpop.permute.xlu0 %240 }
  0xab   : > { %v272_v26 = vpop.permute.xlu1 %271 }
  0xac   : > { %vm292_vm3 = vcmp.eq.s32.totalorder %v2114_v23, %v272_v26 }
  0xad   : > { %vm300_vm6 = vmor %vm260_vm5, %vm292_vm3 }
  0xae   : > { %v275_v27 = vpop.permute.xlu0 %274  ;;  %v2125_v32 = vsel %vm300_vm6, 1.0, %v1859_v31  ;;  %vm214_vm6 = vcmp.eq.s32.totalorder %v2114_v23, %v198_v15 }
  0xaf   : > { %v336_v34 = vsel %vm331_vm7, %v2125_v32, 0  ;;  %vm293_vm15 = vcmp.eq.s32.totalorder %v2114_v23, %v275_v27 }
  0xb0   : > { %v195_v28 = vpop.permute.xlu1 %194  ;;  %v2132_v37 = vsub.f32 %v336_v34, %v336_v34 }
  0xb1   : > { %vm213_vm0 = vcmp.eq.s32.totalorder %v2114_v23, %v195_v28 }
  0xb2   : > { %v2122_v29 = vpop.permute.xlu0 %283  ;;  %v441_v42 = vand.u32 4294901760, %v2132_v37 }
  0xb4   : > { %v442_v50 = vsub.f32 %v2132_v37, %v441_v42 }
  0xb5   : > { %v166_v33 = vpop.permute.xlu1 %165 }
  0xb6   : > { %v443_v57 = vand.u32 4294901760, %v442_v50 }
  0xb7   : > { %v157_v35 = vpop.permute.xlu0 %156 }
  0xb8   : > { %vm179_vm9 = vcmp.eq.s32.totalorder %v2114_v23, %v157_v35 }
  0xb9   : > { %vm219_vm11 = vmor %vm179_vm9, %vm211_vm8  ;;  %vm182_vm8 = vcmp.eq.s32.totalorder %v2114_v23, %v166_v33 }
  0xba   : > { %vm259_vm13 = vmor %vm219_vm11, %vm251_vm10  ;;  %v235_v38 = vpop.permute.xlu1 %234 }
  0xbb   : > { %vm299_vm14 = vmor %vm259_vm13, %vm291_vm12  ;;  %v163_v39 = vpop.permute.xlu0 %162  ;;  %vm253_vm2 = vcmp.eq.s32.totalorder %v2114_v23, %v235_v38 }
  0xbc   : > { %v2138_v40 = vsel %vm299_vm14, 1.0, %v1859_v31  ;;  %vm181_vm1 = vcmp.eq.s32.totalorder %v2114_v23, %v163_v39  ;;  %vm222_vm10 = vmor %vm182_vm8, %vm214_vm6  ;;  %vm215_vm14 = vcmp.eq.s32.totalorder %v2114_v23, %v2112_v17  ;;  %vm255_vm8 = vcmp.eq.s32.totalorder %v2114_v23, %v2116_v25 }
  0xbd   : > { %vm221_vm3 = vmor %vm181_vm1, %vm213_vm0  ;;  %v333_v41 = vsel %vm331_vm7, %v2138_v40, 0  ;;  %vm296_vm1 = vcmp.eq.s32.totalorder %v2114_v23, %v2122_v29 }
  0xbe   : > { %vm261_vm4 = vmor %vm221_vm3, %vm253_vm2  ;;  %v238_v43 = vpop.permute.xlu1 %237  ;;  %v2145_v44 = vsub.f32 %v333_v41, %v333_v41 }
  0xbf   : > { %vm301_vm5 = vmor %vm261_vm4, %vm293_vm15  ;;  %vm254_vm9 = vcmp.eq.s32.totalorder %v2114_v23, %v238_v43  ;;  %v178_v26 = vpop.permute.xlu0 %177 }
  0xc0   : > { %v2150_v46 = vsel %vm301_vm5, 1.0, %v1859_v31  ;;  %v431_v47 = vand.u32 4294901760, %v2145_v44  ;;  %vm262_vm11 = vmor %vm222_vm10, %vm254_vm9 }
  0xc1   : > { %v339_v48 = vsel %vm331_vm7, %v2150_v46, 0 }
  0xc2   : > { %1519 = vmatprep.mubr.f32.mxu0 %v431_v47  ;;  %v432_v51 = vsub.f32 %v2145_v44, %v431_v47  ;;  %v2158_v52 = vsub.f32 %v339_v48, %v339_v48 }
  0xc3   : > { %v278_v53 = vpop.permute.xlu1 %277  ;;  %1520 = vmatmul.mubr.f32.vlgmr.msra.gmra.mrb[0].mxu0 %v441_v42 }
  0xc4   : > { %vm294_vm12 = vcmp.eq.s32.totalorder %v2114_v23, %v278_v53  ;;  %v433_v54 = vand.u32 4294901760, %v432_v51  ;;  %v451_v56 = vand.u32 4294901760, %v2158_v52  ;;  %1654 = vmatpush3.bf16.msra.mxu0 %v2067_v36  ;;  %v250_v28 = vpop.permute.xlu0 %249 }
  0xc5   : > { %vm302_vm13 = vmor %vm262_vm11, %vm294_vm12  ;;  %1656 = vmatprep.subr.bf16.mxu0 %v2085_v49 }
  0xc6   : > { %v2165_v58 = vsel %vm302_vm13, 1.0, %v1859_v31  ;;  %1435 = vmatprep.mubr.f32.mxu1 %v433_v54  ;;  %1522 = vmatprep.mubr.f32.mxu0 %v451_v56  ;;  %v452_v60 = vsub.f32 %v2158_v52, %v451_v56 }
  0xc7   : > { %v342_v61 = vsel %vm331_vm7, %v2165_v58, 0  ;;  %1436 = vmatmul.mubr.f32.vlgmr.msra.gmra.mrb[0].mxu1 %v443_v57 }
  0xc8   : > { %v2170_v62 = vsub.f32 %v342_v61, %v342_v61  ;;  %v169_v63 = vpop.permute.xlu1 %168  ;;  %v453_v0 = vand.u32 4294901760, %v452_v60  ;;  %1606 = vmatpush3.bf16.msra.mxu1 %v2077_v45  ;;  %1658 = vmatpush3.bf16.msra.mxu0 %v2085_v49 }
  0xc9   : > { %1608 = vmatprep.subr.bf16.mxu1 %v2093_v59  ;;  %1660 = vmatprep.subr.bf16.mxu0 %v2088_v55  ;;  %vm183_vm15 = vcmp.eq.s32.totalorder %v2114_v23, %v169_v63 }
  0xca   : > { %1438 = vmatprep.mubr.f32.mxu1 %v453_v0  ;;  %v461_v36 = vand.u32 4294901760, %v2170_v62  ;;  %vm223_vm2 = vmor %vm183_vm15, %vm215_vm14  ;;  %vm186_vm14 = vcmp.eq.s32.totalorder %v2114_v23, %v178_v26 }
  0xcb   : > { %vm263_vm10 = vmor %vm223_vm2, %vm255_vm8 }
  0xcc   : > { %v172_v2 = vpop.permute.xlu1 %171  ;;  %1523 = vmatmul.mubr.f32.gmra.mrb[2].mxu0 %v461_v36  ;;  %v462_v4 = vsub.f32 %v2170_v62, %v461_v36  ;;  %1610 = vmatpush3.bf16.msra.mxu1 %v2093_v59 }
  0xcd   : > { %1662 = vmatpush3.bf16.msra.mxu0 %v2088_v55  ;;  %1612 = vmatprep.subr.bf16.mxu1 %v2098_v1  ;;  %vm184_vm3 = vcmp.eq.s32.totalorder %v2114_v23, %v172_v2 }
  0xce   : > { %v463_v45 = vand.u32 4294901760, %v462_v4  ;;  %1664 = vmatprep.subr.bf16.mxu0 %v2100_v3 }
  0xd0   : > { %1439 = vmatmul.mubr.f32.gmra.mrb[2].mxu1 %v463_v45 }
  0xd1   : > { %v204_v49 = vpop.permute.xlu1 %203  ;;  %1614 = vmatpush3.bf16.msra.mxu1 %v2098_v1  ;;  %1666 = vmatpush3.bf16.msra.mxu0 %v2100_v3 }
  0xd2   : > { %1616 = vmatprep.subr.bf16.mxu1 %v2102_v7  ;;  %1668 = vmatprep.subr.bf16.mxu0 %v1969_v14  ;;  %vm216_vm0 = vcmp.eq.s32.totalorder %v2114_v23, %v204_v49 }
  0xd3   : > { %vm224_vm4 = vmor %vm184_vm3, %vm216_vm0 }
  0xd5   : > { %1618 = vmatpush3.bf16.msra.mxu1 %v2102_v7 }
  0xd6   : > { %v244_v55 = vpop.permute.xlu1 %243  ;;  %1620 = vmatprep.subr.bf16.mxu1 %v2104_v8 }
  0xd7   : > { %vm256_vm5 = vcmp.eq.s32.totalorder %v2114_v23, %v244_v55 }
  0xd8   : > { %vm264_vm6 = vmor %vm224_vm4, %vm256_vm5 }
  0xd9   : > { %vm304_vm9 = vmor %vm264_vm6, %vm296_vm1  ;;  %vm258_vm6 = vcmp.eq.s32.totalorder %v2114_v23, %v250_v28 }
  0xda   : > { %v2199_v59 = vsel %vm304_vm9, 1.0, %v1859_v31 }
  0xdb   : > { %v348_v1 = vsel %vm331_vm7, %v2199_v59, 0  ;;  %v281_v3 = vpop.permute.xlu1 %280 }
  0xdc   : > { %v2203_v5 = vsub.f32 %v348_v1, %v348_v1  ;;  %vm295_vm11 = vcmp.eq.s32.totalorder %v2114_v23, %v281_v3 }
  0xdd   : > { %vm303_vm12 = vmor %vm263_vm10, %vm295_vm11 }
  0xde   : > { %v2207_v6 = vsel %vm303_vm12, 1.0, %v1859_v31  ;;  %v481_v12 = vand.u32 4294901760, %v2203_v5 }
  0xdf   : > { %v345_v7 = vsel %vm331_vm7, %v2207_v6, 0 }
  0xe0   : > { %v2212_v13 = vsub.f32 %v345_v7, %v345_v7  ;;  %v175_v15 = vpop.permute.xlu1 %174  ;;  %v482_v17 = vsub.f32 %v2203_v5, %v481_v12 }
  0xe1   : > { %vm185_vm0 = vcmp.eq.s32.totalorder %v2114_v23, %v175_v15 }
  0xe2   : > { %v471_v16 = vand.u32 4294901760, %v2212_v13  ;;  %v483_v22 = vand.u32 4294901760, %v482_v17 }
  0xe4   : > { %1525 = vmatprep.mubr.f32.mxu0 %v471_v16  ;;  %v472_v18 = vsub.f32 %v2212_v13, %v471_v16 }
  0xe5   : > { %v207_v20 = vpop.permute.xlu1 %206  ;;  %1526 = vmatmul.mubr.f32.gmra.mrb[4].mxu0 %v481_v12 }
  0xe6   : > { %v473_v21 = vand.u32 4294901760, %v472_v18  ;;  %vm217_vm13 = vcmp.eq.s32.totalorder %v2114_v23, %v207_v20 }
  0xe7   : > { %vm225_vm2 = vmor %vm185_vm0, %vm217_vm13 }
  0xe8   : > { %1441 = vmatprep.mubr.f32.mxu1 %v473_v21 }
  0xe9   : > { %v210_v25 = vpop.permute.xlu1 %209  ;;  %1442 = vmatmul.mubr.f32.gmra.mrb[4].mxu1 %v483_v22 }
  0xea   : > { %vm218_vm15 = vcmp.eq.s32.totalorder %v2114_v23, %v210_v25 }
  0xeb   : > { %vm226_vm3 = vmor %vm186_vm14, %vm218_vm15 }
  0xec   : > { %vm266_vm9 = vmor %vm226_vm3, %vm258_vm6 }
  0xee   : > { %v247_v27 = vpop.permute.xlu1 %246 }
  0xef   : > { %vm257_vm1 = vcmp.eq.s32.totalorder %v2114_v23, %v247_v27 }
  0xf0   : > { %vm265_vm4 = vmor %vm225_vm2, %vm257_vm1 }
  0xf3   : > { %v287_v29 = vpop.permute.xlu1 %286 }
  0xf4   : > { %vm297_vm5 = vcmp.eq.s32.totalorder %v2114_v23, %v287_v29 }
  0xf5   : > { %vm305_vm8 = vmor %vm265_vm4, %vm297_vm5 }
  0xf6   : > { %v1291_v33 = vsel %vm305_vm8, 1.0, %v1859_v31 }
  0xf7   : > { %v351_v34 = vsel %vm331_vm7, %v1291_v33, 0  ;;  %v290_v35 = vpop.permute.xlu1 %289 }
  0xf8   : > { %v490_v38 = vsub.f32 %v351_v34, %v351_v34  ;;  %vm298_vm10 = vcmp.eq.s32.totalorder %v2114_v23, %v290_v35 }
  0xf9   : > { %vm306_vm11 = vmor %vm266_vm9, %vm298_vm10 }
  0xfa   : > { %v1292_v39 = vsel %vm306_vm11, 1.0, %v1859_v31  ;;  %v491_v41 = vand.u32 4294901760, %v490_v38 }
  0xfb   : > { %v354_v42 = vsel %vm331_vm7, %v1292_v39, 0 }
  0xfc   : > { %v500_v43 = vsub.f32 %v354_v42, %v354_v42  ;;  %1528 = vmatprep.mubr.f32.mxu0 %v491_v41  ;;  %v492_v47 = vsub.f32 %v490_v38, %v491_v41 }
  0xfe   : > { %v493_v48 = vand.u32 4294901760, %v492_v47  ;;  %v501_v50 = vand.u32 4294901760, %v500_v43 }
 0x100   : > { %1444 = vmatprep.mubr.f32.mxu1 %v493_v48  ;;  %1529 = vmatmul.mubr.f32.gmra.mrb[6].mxu0 %v501_v50  ;;  %v502_v51 = vsub.f32 %v500_v43, %v501_v50 }
 0x101   : > { %1547 = vmatprep.mubr.msk.f32.mxu0 %vm331_vm7, %v2138_v40 }
 0x102   : > { %v503_v53 = vand.u32 4294901760, %v502_v51 }
 0x104   : > { %1445 = vmatmul.mubr.f32.gmra.mrb[6].mxu1 %v503_v53  ;;  %1548 = vmatmul.mubr.msk.f32.vlgmr.msra.gmra.mrb[0].mxu0 %vm331_vm7, %v2125_v32 }
 0x105   : > { %1463 = vmatprep.mubr.msk.f32.mxu1 %vm331_vm7, %v2138_v40  ;;  %1550 = vmatprep.mubr.msk.f32.mxu0 %vm331_vm7, %v2150_v46 }
 0x106   : > { %1670 = vmatpush3.bf16.msra.mxu0 %v1969_v14 }
 0x107   : > { %1672 = vmatprep.subr.bf16.mxu0 %v1991_v19 }
 0x108   : > { %1464 = vmatmul.mubr.msk.f32.vlgmr.msra.gmra.mrb[0].mxu1 %vm331_vm7, %v2125_v32  ;;  %1551 = vmatmul.mubr.msk.f32.gmra.mrb[2].mxu0 %vm331_vm7, %v2165_v58 }
 0x109   : > { %1622 = vmatpush3.bf16.msra.mxu1 %v2104_v8  ;;  %1466 = vmatprep.mubr.msk.f32.mxu1 %vm331_vm7, %v2150_v46 }
 0x10a   : > { %1553 = vmatprep.mubr.msk.f32.mxu0 %vm331_vm7, %v2207_v6  ;;  %1674 = vmatpush3.bf16.msra.mxu0 %v1991_v19 }
 0x10b   : > { %1624 = vmatprep.subr.bf16.mxu1 %v2106_v9  ;;  %1676 = vmatprep.subr.bf16.mxu0 %v2015_v24 }
 0x10c   : > { %1467 = vmatmul.mubr.msk.f32.gmra.mrb[2].mxu1 %vm331_vm7, %v2165_v58  ;;  %1554 = vmatmul.mubr.msk.f32.gmra.mrb[4].mxu0 %vm331_vm7, %v2199_v59 }
 0x10d   : > { %1626 = vmatpush3.bf16.msra.mxu1 %v2106_v9  ;;  %1469 = vmatprep.mubr.msk.f32.mxu1 %vm331_vm7, %v2207_v6 }
 0x10e   : > { %1556 = vmatprep.mubr.msk.f32.mxu0 %vm331_vm7, %v1291_v33  ;;  %1678 = vmatpush3.bf16.msra.mxu0 %v2015_v24 }
 0x10f   : > { %1628 = vmatprep.subr.bf16.mxu1 %v2108_v10  ;;  %1680 = vmatprep.subr.bf16.mxu0 %v2039_v30 }
 0x110   : > { %1470 = vmatmul.mubr.msk.f32.gmra.mrb[4].mxu1 %vm331_vm7, %v2199_v59  ;;  %1557 = vmatmul.mubr.msk.f32.gmra.mrb[6].mxu0 %vm331_vm7, %v1292_v39 }
 0x111   : > { %1630 = vmatpush3.bf16.msra.mxu1 %v2108_v10  ;;  %1472 = vmatprep.mubr.msk.f32.mxu1 %vm331_vm7, %v1291_v33 }
 0x112   : > { %1682 = vmatpush3.bf16.msra.mxu0 %v2039_v30  ;;  %1575 = vmatprep.mubr.msk.f32.mxu0 %vm331_vm7, %v2138_v40 }
 0x113   : > { %1632 = vmatprep.subr.bf16.mxu1 %v2110_v11 }
 0x114   : > { %1473 = vmatmul.mubr.msk.f32.gmra.mrb[6].mxu1 %vm331_vm7, %v1292_v39 }
 0x115   : > { %1634 = vmatpush3.bf16.msra.mxu1 %v2110_v11  ;;  %1576 = vmatmul.mubr.msk.f32.vlgmr.msra.gmra.mrb[0].mxu0 %vm331_vm7, %v2125_v32 }
 0x116   : > { %1491 = vmatprep.mubr.f32.mxu1 %v2145_v44  ;;  %1578 = vmatprep.mubr.msk.f32.mxu0 %vm331_vm7, %v2150_v46 }
 0x118   : > { %1492 = vmatmul.mubr.f32.vlgmr.msra.gmra.mrb[0].mxu1 %v2132_v37 }
 0x119   : > { %1579 = vmatmul.mubr.msk.f32.gmra.mrb[2].mxu0 %vm331_vm7, %v2165_v58  ;;  %1494 = vmatprep.mubr.f32.mxu1 %v2158_v52 }
 0x11a   : > { %1581 = vmatprep.mubr.msk.f32.mxu0 %vm331_vm7, %v2207_v6 }
 0x11c   : > { %1495 = vmatmul.mubr.f32.gmra.mrb[2].mxu1 %v2170_v62 }
 0x11d   : > { %1582 = vmatmul.mubr.msk.f32.gmra.mrb[4].mxu0 %vm331_vm7, %v2199_v59  ;;  %1497 = vmatprep.mubr.f32.mxu1 %v2212_v13 }
 0x11e   : > { %1584 = vmatprep.mubr.msk.f32.mxu0 %vm331_vm7, %v1291_v33 }
 0x120   : > { %1498 = vmatmul.mubr.f32.gmra.mrb[4].mxu1 %v2203_v5 }
 0x121   : > { %1585 = vmatmul.mubr.msk.f32.gmra.mrb[6].mxu0 %vm331_vm7, %v1292_v39  ;;  %1500 = vmatprep.mubr.f32.mxu1 %v490_v38 }
 0x124   : > { %1501 = vmatmul.mubr.f32.gmra.mrb[6].mxu1 %v500_v43 }
 0x1e8   : > { %v1577_v14 = vpop.f32.mrb[0].mxu0 }
 0x1e9   : > { %v1148_v19 = vpop.f32.mrb[1].mxu0 }
 0x1eb   : > { %v1493_v24 = vpop.f32.mrb[0].mxu1 }
 0x1ec   : > { %v1683_v30 = vadd.f32 %v1577_v14, %v1493_v24  ;;  %v1580_v8 = vpop.f32.mrb[2].mxu0  ;;  %v746_v9 = vpop.f32.mrb[1].mxu1 }
 0x1ed   : > { %v1684_v10 = vadd.f32 %v1148_v19, %v746_v9  ;;  %v1160_v11 = vpop.f32.mrb[3].mxu0 }
 0x1ee   : > { %1195 = vst [vmem:[%s137_s25 + $0x8] sm:$0xff] %v1683_v30 }
 0x1ef   : > { %1194 = vst [vmem:[%s137_s25] sm:$0xff] %v1684_v10  ;;  %v1496_v23 = vpop.f32.mrb[2].mxu1 }
 0x1f0   : > { %v1685_v31 = vadd.f32 %v1580_v8, %v1496_v23  ;;  %v1583_v32 = vpop.f32.mrb[4].mxu0  ;;  %v760_v37 = vpop.f32.mrb[3].mxu1 }
 0x1f1   : > { %v1686_v40 = vadd.f32 %v1160_v11, %v760_v37  ;;  %v1172_v44 = vpop.f32.mrb[5].mxu0 }
 0x1f2   : > { %1197 = vst [vmem:[%s137_s25 + $0x18] sm:$0xff] %v1685_v31 }
 0x1f3   : > { %1196 = vst [vmem:[%s137_s25 + $0x10] sm:$0xff] %v1686_v40  ;;  %v1499_v46 = vpop.f32.mrb[4].mxu1 }
 0x1f4   : > { %v1687_v52 = vadd.f32 %v1583_v32, %v1499_v46  ;;  %v1586_v54 = vpop.f32.mrb[6].mxu0  ;;  %v774_v56 = vpop.f32.mrb[5].mxu1 }
 0x1f5   : > { %v1688_v57 = vadd.f32 %v1172_v44, %v774_v56  ;;  %v1184_v58 = vpop.f32.mrb[7].mxu0 }
 0x1f6   : > { %1199 = vst [vmem:[%s137_s25 + $0x28] sm:$0xff] %v1687_v52 }
 0x1f7   : > { %1198 = vst [vmem:[%s137_s25 + $0x20] sm:$0xff] %v1688_v57  ;;  %v1502_v60 = vpop.f32.mrb[6].mxu1 }
 0x1f8   : > { %v1689_v61 = vadd.f32 %v1586_v54, %v1502_v60  ;;  %v788_v62 = vpop.f32.mrb[7].mxu1 }
 0x1f9   : > { %v1690_v63 = vadd.f32 %v1184_v58, %v788_v62 }
 0x1fa   : > { %1201 = vst [vmem:[%s137_s25 + $0x38] sm:$0xff] %v1689_v61 }
 0x1fb   : > { %1200 = vst [vmem:[%s137_s25 + $0x30] sm:$0xff] %v1690_v63 }
 0x1fc   : > { %1804 = shalt.err (!%p1801_p3)
}
 0x1fd   : > { %s1805_s7 = scalar_lea.hbm %s2298_s30, 1024  ;;  %s1809_s16 = scalar_lea.hbm %s2347_s2, 2048 }
 0x1fe   : > { %p1806_p4 = scmp.ne.s32.totalorder %s2298_s30, %s1805_s7  ;;  %p1810_p9 = scmp.lt.u32.totalorder %s2298_s30, %s2347_s2 }
 0x1ff   : > { %p1811_p10 = scmp.lt.u32.totalorder %s1809_s16, %s1805_s7  ;;  %p1813_p12 = scmp.lt.u32.totalorder %s1805_s7, %s2298_s30 }
 0x200   : > { %p1807_p7 = pnand %p1806_p4, %p1916_p5 }
 0x201   : > { %p1812_p11 = por %p1811_p10, %p1810_p9 }
 0x202   : > { %p1808_p8 = pneg %p1807_p7 }
 0x203   : > { %p1814_p13 = por %p1813_p12, %p1812_p11 }
 0x205   : > { %p1815_p0 = pnand %p1814_p13, %p1808_p8 }
 0x207   : > { %1818 = shalt.err (!%p1815_p0)
}
 0x208   : > { %s1861_s22 = smov 128   ;;  %s1862_s23 = smov 8  }
 0x209   : > { %1723 = dma.vmem_to_hbm [thread:$0]  (%p1916_p5), %s2300_s27, 1024, %s2298_s30, %s2304_s13, %s1861_s22, %s1861_s22, %s1862_s23  }
 0x20a PF: > { %p1729_p1 = scmp.ge.s32.totalorder %s1853_s12, 2  ;;  %s1231_s24 = sand.u32 1, %s1841_s9  }
 0x20b   : > { %s1232_s25 = scalar_lea.sflag [#allocation3], %s1231_s24 }
 0x20c   : > { %p1726_p2 = pnand %p1729_p1, %p1920_p6 }
 0x20e   : > { %1836 = dma.done.wait (!%p1726_p2), %s1232_s25, 1024  }
 0x20f   : > { %1838 = vsyncadd (!%p1726_p2), %s1232_s25, 4294966272  ;;  %p12_p3 = scmp.ge.s32.totalorder %s1903_s15, 4   ;;  %s2350_s9 = smov %s1845_s10 }
 0x210   : > { %s2351_s10 = smov %s1849_s11  ;;  %s2352_s11 = smov %s1914_s18 }
 0x211   : > { %s2353_s12 = smov %s1903_s15  ;;  %14 = sbr.rel (!%p12_p3) target bundleno = 3 (0x3), region = 63 }
 0x218   :  { %1237 = vsyncpa [#allocation3], 1 }
 0x219   :  { %1239 = vsyncpa [#allocation3 + $0x1], 1 }

</bundles_post_ra>
